<compile_context>
chip_gen: v5e
topology: v5e:2x2
jax: 0.10.0
libtpu: 0.0.40
codegen_flags: <defaults>
</compile_context>

<pallas_src>
import functools

import jax
import jax.numpy as jnp
from jax.experimental import pallas as pl
from jax.experimental.pallas import tpu as pltpu


_LANE = 128
_MIN_DMA_RUN_BYTES = 512   # min contiguous run per strided-DMA row in the tiled path


def round_width(width, multiplier=0.0625, min_width=8, divisor=8):
    if not multiplier:
        return width
    width *= multiplier
    min_width = min_width or divisor
    width_out = max(min_width, int(width + divisor / 2) // divisor * divisor)
    if width_out < 0.9 * width:
        width_out += divisor
    return int(width_out)


@functools.lru_cache(maxsize=1)
def _tpu_generation_params():
    """Returns (physical_vmem_bytes_per_core, tensorcores_per_device).

    Generation-aware VMEM policy: v5e/v6e have 128 MiB VMEM and 1 TC, v7x has
    64 MiB per TC and 2 TCs.  Falls back to conservative (64 MiB, 1 TC)
    numbers if introspection fails, which is safe on every generation.
    """
    try:
        kind = jax.devices()[0].device_kind.lower()
    except Exception:
        kind = ""

    phys = None
    try:
        info = pltpu.get_tpu_info()
        v = getattr(info, "vmem_capacity_bytes", None)
        if isinstance(v, int) and v > 0:
            phys = v
    except Exception:
        phys = None
    if phys is None:
        # 128 MiB on v2-v6e; 64 MiB per TensorCore on v7x.
        phys = 128 * 1024 * 1024 if (kind and "7" not in kind) else 64 * 1024 * 1024

    # Tensor-core count heuristic (perf-only; wrong guess never breaks
    # correctness): v7x has 2 TCs/chip, v4/v5p megacore also expose 2.
    num_tc = 1
    if "7" in kind or "v4" in kind or "v5p" in kind:
        num_tc = 2
    if "7" in kind:
        # Never trust a per-chip VMEM number on v7x; 64 MiB/TC is the limit.
        phys = min(phys, 64 * 1024 * 1024)

    phys = max(16 * 1024 * 1024, min(int(phys), 128 * 1024 * 1024))
    return phys, num_tc


def _sqex_resident_kernel(w1t_ref, b1_ref, w2t_ref, b2_ref, x_ref, o_ref):
    """x_ref: (Bn, C, S) -- a batch of whole images, fully resident in VMEM."""
    x = x_ref[...]
    # Global average pool (AdaptiveAvgPool3d((1,1,1))), accumulate in f32.
    # block_shape == full (C, S) dims, so Mosaic masks internal lane padding.
    pooled = jnp.mean(x.astype(jnp.float32), axis=2)                     # (Bn, C)
    # fc_1 (1x1x1 conv == matmul, weights pre-transposed) + ReLU.
    h = jnp.dot(pooled, w1t_ref[...], preferred_element_type=jnp.float32) + b1_ref[...]
    h = jnp.maximum(h, 0.0)
    # fc_2 + sigmoid.
    g = jnp.dot(h, w2t_ref[...], preferred_element_type=jnp.float32) + b2_ref[...]
    g = jax.nn.sigmoid(g)                                                # (Bn, C) f32
    # Gate is cast to x.dtype before the multiply (exact for f32 x; for bf16 x
    # this is marginally looser than the f32 PyTorch reference).
    o_ref[...] = (x * g.astype(x.dtype)[:, :, None]).astype(o_ref.dtype)


def _sqex_tiled_kernel(w1t_ref, b1_ref, w2t_ref, b2_ref, x_ref, o_ref,
                       psum_ref, gate_ref, *, s_total, ts):
    """Two-pass S-tiled kernel.  grid = (n_blocks, 2 phases, s_tiles).

    Phase 0: lane-fold each (bn, C, ts) x tile into a (bn, C, 128) f32 partial
    sum with VALU adds (per-128-lane chunk casts, no full-tile f32 copy); only
    the padded last tile pays for the iota/compare/select mask.  At the last
    tile, one cross-lane XLU reduce produces the pooled mean and the sigmoid
    gate.  Phase 1: re-stream the x tiles and apply the gate.
    """
    ph = pl.program_id(1)
    s = pl.program_id(2)
    last_s = pl.num_programs(2) - 1
    nq = ts // _LANE                       # ts is a multiple of 128 by construction
    has_tail = (s_total % ts) != 0

    @pl.when((ph == 0) & (s == 0))
    def _init():
        psum_ref[...] = jnp.zeros_like(psum_ref)

    def _fold_tile(mask_tail):
        def body(q, acc):
            off = pl.multiple_of(q * _LANE, _LANE)
            chunk = x_ref[:, :, pl.ds(off, _LANE)].astype(jnp.float32)
            if mask_tail:
                lane = jax.lax.broadcasted_iota(jnp.int32, chunk.shape, 2)
                chunk = jnp.where(s * ts + off + lane < s_total, chunk, 0.0)
            return acc + chunk
        psum_ref[...] = jax.lax.fori_loop(0, nq, body, psum_ref[...])

    if has_tail:
        @pl.when((ph == 0) & (s != last_s))
        def _acc_full():
            _fold_tile(False)              # full tiles: plain adds, no mask

        @pl.when((ph == 0) & (s == last_s))
        def _acc_tail():
            _fold_tile(True)               # only the padded last tile is masked
    else:
        @pl.when(ph == 0)
        def _acc():
            _fold_tile(False)

    @pl.when((ph == 0) & (s == last_s))
    def _gate():
        pooled = jnp.sum(psum_ref[...], axis=2) * (1.0 / s_total)        # (bn, C)
        h = jnp.dot(pooled, w1t_ref[...], preferred_element_type=jnp.float32) + b1_ref[...]
        h = jnp.maximum(h, 0.0)
        g = jnp.dot(h, w2t_ref[...], preferred_element_type=jnp.float32) + b2_ref[...]
        gate_ref[...] = jax.nn.sigmoid(g)

    @pl.when(ph == 1)
    def _scale():
        xv = x_ref[...]
        g = gate_ref[...].astype(xv.dtype)
        o_ref[...] = (xv * g[:, :, None]).astype(o_ref.dtype)


def sqex_forward(x, w1, b1, w2, b2, *, x_block_budget_bytes=None, donate_x=False):
    """x: (N, C, D, H, W); w1: (Ch, C); b1: (Ch,); w2: (C, Ch); b2: (C,)."""
    N, C, D, H, W = x.shape
    S = D * H * W
    Ch = w1.shape[0]
    itemsize = jnp.dtype(x.dtype).itemsize

    phys_vmem, num_tc = _tpu_generation_params()
    vmem_limit = int(phys_vmem * 0.85)          # scoped VMEM we request from Mosaic
    budget = (int(phys_vmem * 0.60) if x_block_budget_bytes is None
              else int(x_block_budget_bytes))   # what we let x blocks consume
    budget = max(1, min(budget, int(vmem_limit * 0.9)))

    x3 = x.reshape(N, C, S)
    # Pre-transpose weights once in the wrapper -> no in-kernel relayout.
    w1t = jnp.transpose(w1)          # (C, Ch)
    w2t = jnp.transpose(w2)          # (Ch, C)
    b1r = b1.reshape(1, Ch)
    b2r = b2.reshape(1, C)

    param_bytes = (w1.size + b1.size + w2.size + b2.size) * jnp.dtype(w1.dtype).itemsize
    aliases = {4: 0} if donate_x else {}

    # Live VMEM per batch row on the resident path: double-buffered input and
    # output blocks (4 copies at x itemsize) plus one f32 temporary when the
    # pooled sum upcasts a sub-f32 block (v7x OOM guard).
    upcast_bytes = 4 if itemsize < 4 else 0
    resident_row_bytes = C * S * (4 * itemsize + upcast_bytes)

    s_floor = (S // _LANE) * _LANE   # largest lane-aligned tile length <= S

    if resident_row_bytes <= budget or s_floor == 0:
        # ---------- Resident fast path (2x activation traffic) ----------
        bn = max(1, min(N, budget // max(1, resident_row_bytes)))
        if num_tc >= 2 and N >= 2:
            # Only split bn when there are 2 TensorCores (v7x / megacore);
            # on 1-TC parts this would just add per-step overhead.
            bn = min(bn, pl.cdiv(N, num_tc))
        grid = (pl.cdiv(N, bn),)

        out = pl.pallas_call(
            _sqex_resident_kernel,
            out_shape=jax.ShapeDtypeStruct((N, C, S), x.dtype),
            grid=grid,
            in_specs=[
                pl.BlockSpec((C, Ch), lambda i: (0, 0)),        # fc1 weight^T
                pl.BlockSpec((1, Ch), lambda i: (0, 0)),        # fc1 bias
                pl.BlockSpec((Ch, C), lambda i: (0, 0)),        # fc2 weight^T
                pl.BlockSpec((1, C), lambda i: (0, 0)),         # fc2 bias
                pl.BlockSpec((bn, C, S), lambda i: (i, 0, 0)),  # x tile
            ],
            out_specs=pl.BlockSpec((bn, C, S), lambda i: (i, 0, 0)),
            compiler_params=pltpu.CompilerParams(
                dimension_semantics=("parallel",),
                vmem_limit_bytes=vmem_limit,
            ),
            cost_estimate=pl.CostEstimate(
                flops=2 * N * C * S + 4 * N * C * Ch,
                transcendentals=N * C,
                bytes_accessed=2 * N * C * S * itemsize + param_bytes,
            ),
            input_output_aliases=aliases,
        )(w1t, b1r, w2t, b2r, x3)
        return out.reshape(N, C, D, H, W)

    # ---------- S-tiled two-pass fallback (3x activation traffic) ----------
    # Minimum contiguous DMA run per strided row (512 B) -> shrink bn before
    # letting ts drop below it.  ts is always a lane multiple and <= s_floor
    # so the lane-fold in the kernel is exact.
    min_ts = max(_LANE, ((_MIN_DMA_RUN_BYTES // itemsize + _LANE - 1) // _LANE) * _LANE)
    min_ts = min(min_ts, s_floor)

    def _ts_for(b):
        return min(s_floor, (budget // (4 * b * C * itemsize)) // _LANE * _LANE)

    bn = min(N, 8)
    if num_tc >= 2 and N >= 2:
        # Keep >= num_tc blocks on the parallel n axis so both v7x TCs work.
        bn = min(bn, pl.cdiv(N, num_tc))
    bn = max(1, bn)
    ts = _ts_for(bn)
    while bn > 1 and ts < min_ts:
        bn = max(1, bn // 2)
        ts = _ts_for(bn)
    ts = max(min_ts, min(ts, s_floor))

    n_s = pl.cdiv(S, ts)
    grid = (pl.cdiv(N, bn), 2, n_s)

    kernel = functools.partial(_sqex_tiled_kernel, s_total=S, ts=ts)
    out = pl.pallas_call(
        kernel,
        out_shape=jax.ShapeDtypeStruct((N, C, S), x.dtype),
        grid=grid,
        in_specs=[
            pl.BlockSpec((C, Ch), lambda n, p, s: (0, 0)),
            pl.BlockSpec((1, Ch), lambda n, p, s: (0, 0)),
            pl.BlockSpec((Ch, C), lambda n, p, s: (0, 0)),
            pl.BlockSpec((1, C), lambda n, p, s: (0, 0)),
            pl.BlockSpec((bn, C, ts), lambda n, p, s: (n, 0, s)),
        ],
        # REVISIT-SEMANTICS INVARIANT: phase 0 pins the output block index to
        # (n, 0, 0) and never writes o_ref, so the buffer is not flushed while
        # its index is unchanged.  Phase 1 starts at that exact block (n,0,0)
        # and fully writes it before the index changes at s=1, so no
        # uninitialized block is ever written back to HBM, and every written
        # block is flushed exactly once.  Total traffic: 3x instead of 4x.
        out_specs=pl.BlockSpec((bn, C, ts), lambda n, p, s: (n, 0, s * p)),
        scratch_shapes=[
            pltpu.VMEM((bn, C, _LANE), jnp.float32),   # lane-folded pooled sum
            pltpu.VMEM((bn, C), jnp.float32),          # sigmoid gate
        ],
        compiler_params=pltpu.CompilerParams(
            dimension_semantics=("parallel", "arbitrary", "arbitrary"),
            vmem_limit_bytes=vmem_limit,
        ),
        cost_estimate=pl.CostEstimate(
            flops=3 * N * C * S + 4 * N * C * Ch,
            transcendentals=N * C,
            bytes_accessed=3 * N * C * S * itemsize + param_bytes,
        ),
        input_output_aliases=aliases,
    )(w1t, b1r, w2t, b2r, x3)
    return out.reshape(N, C, D, H, W)


def _reference(x, w1, b1, w2, b2):
    pooled = jnp.mean(x, axis=(2, 3, 4))                       # (N, C)
    h = jnp.maximum(pooled @ w1.T + b1, 0.0)                   # (N, Ch)
    g = jax.nn.sigmoid(h @ w2.T + b2)                          # (N, C)
    return x * g[:, :, None, None, None]


if __name__ == "__main__":
    key = jax.random.PRNGKey(0)

    # ---- case 1: resident fast path; S = 192 (not a multiple of 128) ----
    N, C, D, H, W = 4, 16, 4, 8, 6
    Ch = round_width(C)                   # -> 8
    kx, kw1, kb1, kw2, kb2 = jax.random.split(key, 5)
    x = jax.random.normal(kx, (N, C, D, H, W), dtype=jnp.float32)
    w1 = 0.1 * jax.random.normal(kw1, (Ch, C), dtype=jnp.float32)
    b1 = 0.1 * jax.random.normal(kb1, (Ch,), dtype=jnp.float32)
    w2 = 0.1 * jax.random.normal(kw2, (C, Ch), dtype=jnp.float32)
    b2 = 0.1 * jax.random.normal(kb2, (C,), dtype=jnp.float32)

    ref = _reference(x, w1, b1, w2, b2)
    out = jax.block_until_ready(sqex_forward(x, w1, b1, w2, b2))
    assert out.shape == (N, C, D, H, W)
    assert jnp.allclose(out, ref, atol=1e-5, rtol=1e-5)

    # ---- case 2: force the S-tiled fallback (partial last tile, masked) ----
    out_tiled = jax.block_until_ready(
        sqex_forward(x, w1, b1, w2, b2, x_block_budget_bytes=32 * 1024))
    assert jnp.allclose(out_tiled, ref, atol=1e-5, rtol=1e-5)

    # ---- case 3: force the fallback with S a multiple of 128 (no mask) ----
    N2, C2, D2, H2, W2 = 2, 16, 2, 8, 16          # S = 256
    kx2 = jax.random.fold_in(kx, 1)
    x2 = jax.random.normal(kx2, (N2, C2, D2, H2, W2), dtype=jnp.float32)
    ref2 = _reference(x2, w1, b1, w2, b2)
    out2 = jax.block_until_ready(
        sqex_forward(x2, w1, b1, w2, b2, x_block_budget_bytes=32 * 1024))
    assert jnp.allclose(out2, ref2, atol=1e-5, rtol=1e-5)

    print("KERNEL_OK")
</pallas_src>

<mosaic_0001>
module attributes {stable_mosaic.version = 11 : i64} {
  func.func @_sqex_resident_kernel(%arg0: i32, %arg1: memref<16x8xf32, #tpu.memory_space<vmem>>, %arg2: memref<1x8xf32, #tpu.memory_space<vmem>>, %arg3: memref<8x16xf32, #tpu.memory_space<vmem>>, %arg4: memref<1x16xf32, #tpu.memory_space<vmem>>, %arg5: memref<4x16x192xf32, #tpu.memory_space<vmem>>, %arg6: memref<4x16x192xf32, #tpu.memory_space<vmem>>) attributes {dimension_semantics = [#tpu.dimension_semantics<parallel>], iteration_bounds = array<i64: 1>, scalar_prefetch = 0 : i64, scratch_operands = 0 : i64, tpu.core_type = #tpu.core_type<tc>, window_params = [{pipeline_mode = #tpu.pipeline_mode<synchronous>, transform_indices = @transform_0, window_bounds = array<i64: 16, 8>}, {pipeline_mode = #tpu.pipeline_mode<synchronous>, transform_indices = @transform_1, window_bounds = array<i64: 1, 8>}, {pipeline_mode = #tpu.pipeline_mode<synchronous>, transform_indices = @transform_2, window_bounds = array<i64: 8, 16>}, {pipeline_mode = #tpu.pipeline_mode<synchronous>, transform_indices = @transform_3, window_bounds = array<i64: 1, 16>}, {transform_indices = @transform_4, window_bounds = array<i64: 4, 16, 192>}, {transform_indices = @transform_5, window_bounds = array<i64: 4, 16, 192>}]} {
    %c0 = arith.constant 0 : index
    %c0_0 = arith.constant 0 : index
    %c0_1 = arith.constant 0 : index
    %0 = vector.load %arg5[%c0, %c0_0, %c0_1] : memref<4x16x192xf32, #tpu.memory_space<vmem>>, vector<4x16x192xf32>
    %cst = arith.constant dense<0.000000e+00> : vector<4x16xf32>
    %1 = vector.multi_reduction <add>, %0, %cst [2] : vector<4x16x192xf32> to vector<4x16xf32>
    %cst_2 = arith.constant 1.920000e+02 : f32
    %2 = vector.broadcast %cst_2 : f32 to vector<4x16xf32>
    %3 = arith.divf %1, %2 : vector<4x16xf32>
    %c0_3 = arith.constant 0 : index
    %c0_4 = arith.constant 0 : index
    %4 = vector.load %arg1[%c0_3, %c0_4] : memref<16x8xf32, #tpu.memory_space<vmem>>, vector<16x8xf32>
    %cst_5 = arith.constant dense<0.000000e+00> : vector<4x8xf32>
    %5 = tpu.matmul %3, %4, %cst_5 {dimension_numbers = #tpu.dot_dimension_numbers<[1], [0], [0], [1], [0, 0, 1, 1], [], []>} : vector<4x16xf32>, vector<16x8xf32>, vector<4x8xf32> -> vector<4x8xf32>
    %c0_6 = arith.constant 0 : index
    %c0_7 = arith.constant 0 : index
    %6 = vector.load %arg2[%c0_6, %c0_7] : memref<1x8xf32, #tpu.memory_space<vmem>>, vector<1x8xf32>
    %7 = vector.broadcast %6 : vector<1x8xf32> to vector<4x8xf32>
    %8 = arith.addf %5, %7 : vector<4x8xf32>
    %cst_8 = arith.constant 0.000000e+00 : f32
    %9 = vector.broadcast %cst_8 : f32 to vector<4x8xf32>
    %10 = arith.maximumf %8, %9 : vector<4x8xf32>
    %c0_9 = arith.constant 0 : index
    %c0_10 = arith.constant 0 : index
    %11 = vector.load %arg3[%c0_9, %c0_10] : memref<8x16xf32, #tpu.memory_space<vmem>>, vector<8x16xf32>
    %cst_11 = arith.constant dense<0.000000e+00> : vector<4x16xf32>
    %12 = tpu.matmul %10, %11, %cst_11 {dimension_numbers = #tpu.dot_dimension_numbers<[1], [0], [0], [1], [0, 0, 1, 1], [], []>} : vector<4x8xf32>, vector<8x16xf32>, vector<4x16xf32> -> vector<4x16xf32>
    %c0_12 = arith.constant 0 : index
    %c0_13 = arith.constant 0 : index
    %13 = vector.load %arg4[%c0_12, %c0_13] : memref<1x16xf32, #tpu.memory_space<vmem>>, vector<1x16xf32>
    %14 = vector.broadcast %13 : vector<1x16xf32> to vector<4x16xf32>
    %15 = arith.addf %12, %14 : vector<4x16xf32>
    %16 = arith.negf %15 : vector<4x16xf32>
    %17 = math.exp %16 : vector<4x16xf32>
    %cst_14 = arith.constant 1.000000e+00 : f32
    %18 = vector.broadcast %cst_14 : f32 to vector<4x16xf32>
    %19 = arith.addf %18, %17 : vector<4x16xf32>
    %20 = arith.divf %18, %19 : vector<4x16xf32>
    %21 = vector.shape_cast %20 : vector<4x16xf32> to vector<4x16x1xf32>
    %22 = vector.broadcast %21 : vector<4x16x1xf32> to vector<4x16x192xf32>
    %23 = arith.mulf %0, %22 : vector<4x16x192xf32>
    %c0_15 = arith.constant 0 : index
    %c0_16 = arith.constant 0 : index
    %c0_17 = arith.constant 0 : index
    %24 = vector.load %arg6[%c0_15, %c0_16, %c0_17] : memref<4x16x192xf32, #tpu.memory_space<vmem>>, vector<4x16x192xf32>
    tpu.vector_store %arg6[%c0_15, %c0_16, %c0_17], %23 {strides = array<i32>} : memref<4x16x192xf32, #tpu.memory_space<vmem>>, vector<4x16x192xf32>,
    return
  }
  func.func @transform_0(%arg0: i32) -> (i32, i32) {
    %c0_i32 = arith.constant 0 : i32
    %c0_i32_0 = arith.constant 0 : i32
    %c0_i32_1 = arith.constant 0 : i32
    return %c0_i32, %c0_i32_0 : i32, i32
  }
  func.func @transform_1(%arg0: i32) -> (i32, i32) {
    %c0_i32 = arith.constant 0 : i32
    %c0_i32_0 = arith.constant 0 : i32
    %c0_i32_1 = arith.constant 0 : i32
    return %c0_i32, %c0_i32_0 : i32, i32
  }
  func.func @transform_2(%arg0: i32) -> (i32, i32) {
    %c0_i32 = arith.constant 0 : i32
    %c0_i32_0 = arith.constant 0 : i32
    %c0_i32_1 = arith.constant 0 : i32
    return %c0_i32, %c0_i32_0 : i32, i32
  }
  func.func @transform_3(%arg0: i32) -> (i32, i32) {
    %c0_i32 = arith.constant 0 : i32
    %c0_i32_0 = arith.constant 0 : i32
    %c0_i32_1 = arith.constant 0 : i32
    return %c0_i32, %c0_i32_0 : i32, i32
  }
  func.func @transform_4(%arg0: i32) -> (i32, i32, i32) {
    %c0_i32 = arith.constant 0 : i32
    %c0_i32_0 = arith.constant 0 : i32
    %c0_i32_1 = arith.constant 0 : i32
    return %arg0, %c0_i32, %c0_i32_0 : i32, i32, i32
  }
  func.func @transform_5(%arg0: i32) -> (i32, i32, i32) {
    %c0_i32 = arith.constant 0 : i32
    %c0_i32_0 = arith.constant 0 : i32
    %c0_i32_1 = arith.constant 0 : i32
    return %arg0, %c0_i32, %c0_i32_0 : i32, i32, i32
  }
}

</mosaic_0001>

<bundles_post_ra>
// kernel: tpu_custom_call.1
= control target key start
LH: loop header
LB: loop body
LE: loop exit
PB: predicated region body
PF: predicated region fallthrough
CT: control target
= control target key end

     0   :  { %10 = vsyncpa [#allocation3], 0  ;;  %s532_s0 = inlined_call_operand.vmem [shape: f32[16,8], index: 0, kind: input, shape index: {}]   ;;  %s533_s1 = inlined_call_operand.vmem [shape: f32[1,8], index: 1, kind: input, shape index: {}]   ;;  %s534_s2 = inlined_call_operand.vmem [shape: f32[8,16], index: 2, kind: input, shape index: {}]   ;;  %s535_s3 = inlined_call_operand.vmem [shape: f32[1,16], index: 3, kind: input, shape index: {}]   ;;  %s536_s4 = inlined_call_operand.hbm [shape: f32[4,16,192], index: 4, kind: input, shape index: {}]   ;;  %s537_s5 = inlined_call_operand.hbm [shape: f32[4,16,192], index: 5, kind: output, shape index: {}]  }
   0x1   :  { %11 = vsyncpa [#allocation4], 0  ;;  %s24_s20 = sshll.u32 %s536_s4, 4  ;;  %s386_s21 = smov [#allocation2]   ;;  %s25_s20 = int_to_ptr.hbm [resolvable:$true] %s24_s20 }
   0x2   :  { %s26_s22 = sshll.u32 %s386_s21, 4  ;;  %s387_s23 = smov 256   ;;  %s27_s22 = int_to_ptr.vmem [resolvable:$true] %s26_s22 }
   0x3   :  { %s388_s24 = smov 16  }
   0x4   :  { %32 = dma.hbm_to_vmem [thread:$0]  %s25_s20, 2048, %s27_s22, [#allocation3], %s387_s23, %s387_s23, %s388_s24  }
   0x5   :  { %382 = dma.done.wait [#allocation3], 2048  }
   0x6   :  { %383 = vsyncadd [#allocation3], 4294965248  ;;  %vm53_vm0 = vcmask 523264   ;;  %v427_v0 = vld [vmem:[#allocation2 + $0x40] sm:$0xff]  ;;  %v429_v1 = vld [vmem:[#allocation2 + $0x48] sm:$0xff]  ;;  %v389_v32 = vmov 192.0   ;;  %v115_v42 = vlaneseq }
   0x7   :  { %v431_v2 = vld [vmem:[#allocation2 + $0x20] sm:$0xff]  ;;  %v70_v3 = vsel %vm53_vm0, %v429_v1, 0.0  ;;  %v435_v4 = vld [vmem:[#allocation2 + $0x28] sm:$0xff]  ;;  %v446_v10 = vld [vmem:[#allocation2 + $0x58] sm:$0xff]  ;;  %328 = vrcp.f32 %v389_v32  ;;  %vm120_vm2 = vcmask 130112   ;;  %vm131_vm3 = vcmask 1041409  }
   0x8   :  { %v437_v5 = vld [vmem:[#allocation2] sm:$0xff]  ;;  %v439_v6 = vld [vmem:[#allocation2 + $0x8] sm:$0xff]  ;;  %v71_v7 = vadd.f32 %v70_v3, %v427_v0  ;;  %v62_v8 = vsel %vm53_vm0, %v435_v4, 0.0  ;;  %v450_v13 = vld [vmem:[#allocation2 + $0x38] sm:$0xff]  ;;  %v74_v16 = vsel %vm53_vm0, %v446_v10, 0.0  ;;  %v116_v44 = vand.u32 127, %v115_v42 }
   0x9   :  { %v54_v9 = vsel %vm53_vm0, %v439_v6, 0.0  ;;  %v63_v11 = vadd.f32 %v62_v8, %v431_v2  ;;  %v452_v14 = vld [vmem:[#allocation2 + $0x18] sm:$0xff]  ;;  %v454_v15 = vld [vmem:[#allocation2 + $0x50] sm:$0xff]  ;;  %v66_v18 = vsel %vm53_vm0, %v450_v13, 0.0  ;;  %v471_v25 = vld [vmem:[#allocation2 + $0x68] sm:$0xff]  ;;  %vm133_vm4 = vcmask 1042434  }
   0xa   :  { %v55_v12 = vadd.f32 %v54_v9, %v437_v5  ;;  %72 = vadd.xlane.f32.xlu2 %v71_v7  ;;  %v458_v17 = vld [vmem:[#allocation2 + $0x30] sm:$0xff]  ;;  %v58_v20 = vsel %vm53_vm0, %v452_v14, 0.0  ;;  %v75_v21 = vadd.f32 %v74_v16, %v454_v15  ;;  %v469_v24 = vld [vmem:[#allocation2 + $0x78] sm:$0xff]  ;;  %v477_v28 = vld [vmem:[#allocation2 + $0x60] sm:$0xff]  ;;  %v78_v29 = vsel %vm53_vm0, %v471_v25, 0.0  ;;  %s299_s9 = sshll.u32 %s537_s5, 4  ;;  %s300_s9 = int_to_ptr.hbm [resolvable:$true] %s299_s9 }
   0xb   :  { %64 = vadd.xlane.f32.xlu1 %v63_v11  ;;  %v462_v19 = vld [vmem:[#allocation2 + $0x10] sm:$0xff]  ;;  %v67_v22 = vadd.f32 %v66_v18, %v458_v17  ;;  %v82_v27 = vsel %vm53_vm0, %v469_v24, 0.0  ;;  %v79_v31 = vadd.f32 %v78_v29, %v477_v28  ;;  %v102_v34 = vld [vmem:[%s532_s0 + $0x8] sm:$0xff]  ;;  %v101_v35 = vld [vmem:[%s532_s0] sm:$0xff]  ;;  %v118_v46 = vadd.s32 4294967288, %v116_v44 }
   0xc   :  { %56 = vadd.xlane.f32.xlu0 %v55_v12  ;;  %v59_v23 = vadd.f32 %v58_v20, %v462_v19  ;;  %v473_v26 = vld [vmem:[#allocation2 + $0x70] sm:$0xff]  ;;  %154 = vmatpush.msra.mxu0 %v102_v34  ;;  %vm135_vm5 = vcmask 1043459   ;;  %vm137_vm6 = vcmask 130048   ;;  %vm166_vm7 = vcmask 64512   ;;  %v327_v34 = vld [vmem:[%s535_s3] ss:$0 sm:$0xff] }
   0xd   :  { %v83_v30 = vadd.f32 %v82_v27, %v473_v26  ;;  %v329_v33 = vpop.eup %328  ;;  %v326_v27 = vld [vmem:[%s533_s1] ss:$0 sm:$0xff]  ;;  %v211_v32 = vshrl.u32 %v115_v42, 7  ;;  %s390_s1 = smov [#allocation5]  }
   0xe   :  { %v87_v36 = vmul.f32 192.0, %v329_v33  ;;  %155 = vmatpush.msra.mxu0 %v101_v35  ;;  %vm91_vm1 = vweird.f32 %v329_v33 }
   0xf   :  { %322 = vset.pattern.permute.xlu1 %v211_v32  ;;  %320 = vset.pattern.permute.xlu2 %v211_v32 }
  0x10   :  { %v88_v37 = vsub.f32 1.0, %v87_v36 }
  0x12   :  { %76 = vadd.xlane.f32.xlu2 %v75_v21  ;;  %v89_v38 = vmul.f32 %v329_v33, %v88_v37 }
  0x13   :  { %68 = vadd.xlane.f32.xlu1 %v67_v22 }
  0x14   :  { %60 = vadd.xlane.f32.xlu0 %v59_v23  ;;  %v90_v43 = vadd.f32 %v329_v33, %v89_v38  ;;  %v161_v23 = vld [vmem:[%s534_s2] sm:$0xff]  ;;  %s297_s2 = sshll.u32 %s390_s1, 4  ;;  %s298_s2 = int_to_ptr.vmem [resolvable:$true] %s297_s2 }
  0x15   :  { %185 = vmatpush.msra.mxu1 %v161_v23 }
  0x16   :  { %v92_v45 = vsel %vm91_vm1, %v329_v33, %v90_v43  ;;  %v218_v33 = vadd.s32 8, %v211_v32 }
  0x18   :  { %321 = vset.pattern.permute.xlu0 %v218_v33 }
  0x1b   :  { %84 = vadd.xlane.f32.xlu1 %v83_v30 }
  0x1c   :  { %80 = vadd.xlane.f32.xlu0 %v79_v31 }
  0x7d   :  { %v73_v39 = vpop.xlane.xlu2 %72 }
  0x7e   :  { %v65_v40 = vpop.xlane.xlu1 %64  ;;  %v97_v54 = vmul.f32 %v92_v45, %v73_v39 }
  0x7f   :  { %v57_v41 = vpop.xlane.xlu0 %56  ;;  %v95_v50 = vmul.f32 %v92_v45, %v65_v40 }
  0x80   :  { %v93_v51 = vmul.f32 %v92_v45, %v57_v41  ;;  %v125_v60 = vperm.slane %v97_v54, %v116_v44 }
  0x81   :  { %v122_v58 = vperm.slane %v95_v50, %v116_v44 }
  0x82   :  { %v117_v59 = vperm.slane %v93_v51, %v116_v44 }
  0x85   :  { %v77_v47 = vpop.xlane.xlu2 %76 }
  0x86   :  { %v69_v48 = vpop.xlane.xlu1 %68  ;;  %v98_v55 = vmul.f32 %v92_v45, %v77_v47 }
  0x87   :  { %v61_v49 = vpop.xlane.xlu0 %60  ;;  %v96_v52 = vmul.f32 %v92_v45, %v69_v48 }
  0x88   :  { %v94_v53 = vmul.f32 %v92_v45, %v61_v49  ;;  %v126_v61 = vperm.slane %v98_v55, %v118_v46 }
  0x89   :  { %v123_v56 = vperm.slane %v96_v52, %v118_v46 }
  0x8a   :  { %v119_v57 = vperm.slane %v94_v53, %v118_v46  ;;  %v127_v11 = vsel %vm120_vm2, %v126_v61, %v125_v60 }
  0x8b   :  { %v124_v62 = vsel %vm120_vm2, %v123_v56, %v122_v58 }
  0x8c   :  { %v121_v63 = vsel %vm120_vm2, %v119_v57, %v117_v59 }
  0x8d   :  { %v132_v12 = vsel %vm131_vm3, %v124_v62, %v121_v63 }
  0x8e   :  { %v85_v3 = vpop.xlane.xlu1 %84  ;;  %v134_v21 = vsel %vm133_vm4, %v127_v11, %v132_v12 }
  0x8f   :  { %v81_v7 = vpop.xlane.xlu0 %80  ;;  %v100_v8 = vmul.f32 %v92_v45, %v85_v3 }
  0x90   :  { %v99_v9 = vmul.f32 %v92_v45, %v81_v7 }
  0x91   :  { %v129_v16 = vperm.slane %v100_v8, %v118_v46 }
  0x92   :  { %v128_v18 = vperm.slane %v99_v9, %v116_v44 }
  0x94   :  { %v130_v20 = vsel %vm120_vm2, %v129_v16, %v128_v18 }
  0x95   :  { %v136_v22 = vsel %vm135_vm5, %v130_v20, %v134_v21 }
  0x96   :  { %312 = vmatmul.msk.f32.vlgmr.msra.gmra.mxu0 %vm137_vm6, %v136_v22 }
 0x113   :  { %v157_v29 = vpop.f32.mrf.mxu0 }
 0x114   :  { %v158_v30 = vadd.f32 %v326_v27, %v157_v29 }
 0x116   :  { %v160_v31 = vmax.f32 %v158_v30, 0.0 }
 0x118   :  { %313 = vmatmul.msk.f32.vlgmr.msra.gmra.mxu1 %vm166_vm7, %v160_v31 }
 0x195   :  { %v187_v35 = vpop.f32.mrf.mxu1 }
 0x196   :  { %v188_v36 = vadd.f32 %v327_v34, %v187_v35 }
 0x198   :  { %v314_v37 = vmul.f32 -1.442695, %v188_v36 }
 0x19a   :  { %330 = vpow2.f32 %v314_v37 }
 0x1a0   :  { %v331_v38 = vpop.eup %330 }
 0x1a1   :  { %v193_v39 = vadd.f32 1.0, %v331_v38 }
 0x1a3   :  { %332 = vrcp.f32 %v193_v39  ;;  %v205_v44 = vand.u32 2147483648, %v193_v39  ;;  %v203_v45 = vand.u32 2147483647, %v193_v39  ;;  %vm199_vm9 = vweird.f32 %v193_v39 }
 0x1a5   :  { %v206_v47 = vor.u32 1.1754944e-38, %v205_v44  ;;  %vm204_vm11 = vcmp.eq.f32.partialorder %v203_v45, 8.507059e+37 }
 0x1a9   :  { %v333_v40 = vpop.eup %332 }
 0x1aa   :  { %v195_v41 = vmul.f32 %v333_v40, %v193_v39  ;;  %vm200_vm8 = vweird.f32 %v333_v40 }
 0x1ab   :  { %vm201_vm10 = vmor %vm199_vm9, %vm200_vm8 }
 0x1ac   :  { %v196_v43 = vsub.f32 1.0, %v195_v41 }
 0x1ae   :  { %v197_v42 = vmul.f32 %v333_v40, %v196_v43 }
 0x1b0   :  { %v198_v46 = vadd.f32 %v333_v40, %v197_v42 }
 0x1b2   :  { %v202_v48 = vsel %vm201_vm10, %v333_v40, %v198_v46 }
 0x1b3   :  { %v207_v49 = vsel %vm204_vm11, %v206_v47, %v202_v48 }
 0x1b4   :  { %v222_v50 = vperm.slane %v207_v49, 1  ;;  %v209_v51 = vperm.slane %v207_v49, 0  ;;  %v235_v52 = vperm.slane %v207_v49, 2  ;;  %v248_v53 = vperm.slane %v207_v49, 3 }
 0x1b6   :  { %227 = vperm.xlu1 %322, %v222_v50   ;;  %220 = vperm.xlu0 %321, %v209_v51  }
 0x1b7   :  { %214 = vperm.xlu2 %320, %v209_v51  }
 0x1be   :  { %325 = vset.pattern.permute.xlu1 %v218_v33 }
 0x1bf   :  { %323 = vset.pattern.permute.xlu2 %v218_v33 }
 0x1c6   :  { %246 = vperm.xlu1 %325, %v235_v52  }
 0x1c7   :  { %233 = vperm.xlu2 %323, %v222_v50  }
 0x1ce   :  { %259 = vperm.xlu1 %325, %v248_v53  }
 0x1cf   :  { %324 = vset.pattern.permute.xlu2 %v211_v32 }
 0x1d7   :  { %240 = vperm.xlu2 %324, %v235_v52  }
 0x1df   :  { %253 = vperm.xlu2 %324, %v248_v53  }
 0x211   :  { %v215_v54 = vpop.permute.xlu2 %214 }
 0x212   :  { %v261_v55 = vmul.f32 %v215_v54, %v437_v5  ;;  %v262_v56 = vmul.f32 %v215_v54, %v439_v6 }
 0x214   :  { %277 = vst [vmem:[#allocation5] sm:$0xff] %v261_v55 }
 0x215   :  { %278 = vst.msk [vmem:[#allocation5 + $0x8] sm:$0xff] %vm53_vm0, %v262_v56 }
 0x221   :  { %v234_v57 = vpop.permute.xlu2 %233 }
 0x222   :  { %v267_v58 = vmul.f32 %v234_v57, %v458_v17  ;;  %v268_v59 = vmul.f32 %v234_v57, %v450_v13 }
 0x224   :  { %283 = vst [vmem:[#allocation5 + $0x30] sm:$0xff] %v267_v58 }
 0x225   :  { %284 = vst.msk [vmem:[#allocation5 + $0x38] sm:$0xff] %vm53_vm0, %v268_v59 }
 0x228   :  { %v228_v60 = vpop.permute.xlu1 %227  ;;  %v221_v61 = vpop.permute.xlu0 %220 }
 0x229   :  { %v265_v62 = vmul.f32 %v228_v60, %v431_v2  ;;  %v266_v63 = vmul.f32 %v228_v60, %v435_v4  ;;  %v263_v5 = vmul.f32 %v221_v61, %v462_v19  ;;  %v264_v6 = vmul.f32 %v221_v61, %v452_v14 }
 0x22b   :  { %281 = vst [vmem:[#allocation5 + $0x20] sm:$0xff] %v265_v62 }
 0x22c   :  { %282 = vst.msk [vmem:[#allocation5 + $0x28] sm:$0xff] %vm53_vm0, %v266_v63 }
 0x22d   :  { %279 = vst [vmem:[#allocation5 + $0x10] sm:$0xff] %v263_v5 }
 0x22e   :  { %280 = vst.msk [vmem:[#allocation5 + $0x18] sm:$0xff] %vm53_vm0, %v264_v6 }
 0x231   :  { %v241_v13 = vpop.permute.xlu2 %240 }
 0x232   :  { %v269_v17 = vmul.f32 %v241_v13, %v427_v0  ;;  %v270_v3 = vmul.f32 %v241_v13, %v429_v1 }
 0x234   :  { %285 = vst [vmem:[#allocation5 + $0x40] sm:$0xff] %v269_v17 }
 0x235   :  { %286 = vst.msk [vmem:[#allocation5 + $0x48] sm:$0xff] %vm53_vm0, %v270_v3 }
 0x238   :  { %v247_v2 = vpop.permute.xlu1 %246 }
 0x239   :  { %v271_v4 = vmul.f32 %v247_v2, %v454_v15  ;;  %v272_v19 = vmul.f32 %v247_v2, %v446_v10  ;;  %v254_v14 = vpop.permute.xlu2 %253 }
 0x23a   :  { %v273_v7 = vmul.f32 %v254_v14, %v477_v28  ;;  %v274_v8 = vmul.f32 %v254_v14, %v471_v25 }
 0x23b   :  { %287 = vst [vmem:[#allocation5 + $0x50] sm:$0xff] %v271_v4 }
 0x23c   :  { %288 = vst.msk [vmem:[#allocation5 + $0x58] sm:$0xff] %vm53_vm0, %v272_v19 }
 0x23d   :  { %289 = vst [vmem:[#allocation5 + $0x60] sm:$0xff] %v273_v7 }
 0x23e   :  { %290 = vst.msk [vmem:[#allocation5 + $0x68] sm:$0xff] %vm53_vm0, %v274_v8 }
 0x240   :  { %v260_v0 = vpop.permute.xlu1 %259 }
 0x241   :  { %v275_v1 = vmul.f32 %v260_v0, %v473_v26  ;;  %v276_v10 = vmul.f32 %v260_v0, %v469_v24 }
 0x243   :  { %291 = vst [vmem:[#allocation5 + $0x70] sm:$0xff] %v275_v1 }
 0x244   :  { %292 = vst.msk [vmem:[#allocation5 + $0x78] sm:$0xff] %vm53_vm0, %v276_v10 }
 0x245   :  { %305 = dma.vmem_to_hbm [thread:$0]  %s298_s2, 2048, %s300_s9, [#allocation4], %s387_s23, %s387_s23, %s388_s24  }
 0x246   :  { %384 = dma.done.wait [#allocation4], 2048  }
 0x247   :  { %385 = vsyncadd [#allocation4], 4294965248 }
 0x248   :  { %310 = vsyncpa [#allocation3], 1 }
 0x249   :  { %311 = vsyncpa [#allocation4], 1 }

</bundles_post_ra>
